<compile_context>
chip_gen: v7x
topology: tpu7x:2x2x1
jax: 0.10.0
libtpu: 0.0.40
codegen_flags: <defaults>
</compile_context>

<pallas_src>
import jax
import jax.numpy as jnp
from jax.experimental import pallas as pl
from jax.experimental.pallas import tpu as pltpu

EPS = 1e-5


def _make_block_kernel(L, NL):
    """Build the kernel body for a fixed (sequence length L, total rows NL)."""
    inv_n = 1.0 / float(NL)

    def kernel(x_ref, w1_ref, w2_ref, g_ref, b_ref, out_ref):
        # x_ref:   (NL, Cp)    f32   rows = (batch, position) flattened, lanes = channels
        # w1/w2:   (3*Cp, Cp)  bf16  taps stacked along K (tap-major, then Cin)
        # g/b:     (1, Cp)     f32   batch_norm2 gamma / beta (zero in padded lanes)
        # out_ref: (NL, Cp)    f32
        x = x_ref[...].astype(jnp.float32)
        w1 = w1_ref[...]
        w2 = w2_ref[...]
        gamma = g_ref[...]
        beta = b_ref[...]

        # Row masks for the conv halo: after rolling along the flattened row
        # axis, rows that would read across the sequence (or batch) boundary
        # must contribute zero (this reproduces Conv1d padding=1).
        row = jax.lax.broadcasted_iota(jnp.int32, (NL, 1), 0)
        not_first = (row % L) != 0          # position l == 0  -> tap k=0 is zero
        not_last = (row % L) != (L - 1)     # position l == L-1 -> tap k=2 is zero

        def conv3(h, w):
            # h: (NL, Cp) f32 -> single fused matmul with K = 3*Cp on the MXU.
            # roll(+1)  : result[r] = h[r-1]   (tap k = 0, i.e. x[l-1])
            # roll(NL-1): result[r] = h[r+1]   (tap k = 2, i.e. x[l+1]) -- uses a
            #             non-negative shift equivalent to -1 mod NL.
            up = jnp.where(not_first, pltpu.roll(h, shift=1, axis=0), 0.0)
            dn = jnp.where(not_last, pltpu.roll(h, shift=NL - 1, axis=0), 0.0)
            ops = jnp.concatenate(
                [up.astype(jnp.bfloat16),
                 h.astype(jnp.bfloat16),
                 dn.astype(jnp.bfloat16)], axis=-1)          # (NL, 3*Cp) bf16
            return jnp.dot(ops, w, preferred_element_type=jnp.float32)

        def batchnorm(h):
            # Training-mode BN, one pass: var = E[h^2] - mean^2 (clamped >= 0),
            # affine folded into per-channel scale/shift.
            s = jnp.sum(h, axis=0, keepdims=True)            # (1, Cp)
            ss = jnp.sum(h * h, axis=0, keepdims=True)       # (1, Cp)
            mean = s * inv_n
            var = jnp.maximum(ss * inv_n - mean * mean, 0.0)
            scale = gamma * jax.lax.rsqrt(var + EPS)         # EUP rsqrt
            shift = beta - mean * scale
            return h * scale + shift

        # --- conv1 -> bn2 -> relu ---
        h1 = jnp.maximum(batchnorm(conv3(x, w1)), 0.0)
        # --- conv2 -> bn2 ---
        h2 = batchnorm(conv3(h1, w2))
        # --- residual add + relu --- (i_downsample is None => identity = x)
        out_ref[...] = jnp.maximum(h2 + x, 0.0).astype(out_ref.dtype)

    return kernel


def block_forward(x_ncl, w1, w2, gamma, beta):
    """x_ncl: (N, C, L) f32 (PyTorch NCL). w1/w2: (Cout, Cin, 3). gamma/beta: (C,)."""
    N, C, L = x_ncl.shape
    NL = N * L
    Cp = ((C + 127) // 128) * 128           # lane-dense channel padding

    # ---- glue: layout change + zero channel padding + weight re-layout ----
    x_nlc = jnp.transpose(x_ncl, (0, 2, 1)).reshape(NL, C)          # rows x channels
    x_p = jnp.zeros((NL, Cp), x_ncl.dtype).at[:, :C].set(x_nlc)

    def pack_weight(w):
        wk = jnp.transpose(w, (2, 1, 0))                            # (3, Cin, Cout)
        wp = jnp.zeros((3, Cp, Cp), jnp.float32).at[:, :C, :C].set(wk)
        return wp.reshape(3 * Cp, Cp).astype(jnp.bfloat16)          # K = tap*Cp + ci

    w1k = pack_weight(w1)
    w2k = pack_weight(w2)
    g_p = jnp.zeros((1, Cp), jnp.float32).at[0, :C].set(gamma)
    b_p = jnp.zeros((1, Cp), jnp.float32).at[0, :C].set(beta)

    # ---- advisory cost + VMEM sizing ----
    flops = 2 * (2 * NL * (3 * Cp) * Cp) + 24 * NL * Cp
    transcendentals = 2 * Cp
    bytes_accessed = 2 * NL * Cp * 4 + 2 * (3 * Cp * Cp) * 2 + 4 * Cp * 4
    vmem_needed = (2 * NL * Cp + 2 * NL * 3 * Cp) * 4 + 2 * (3 * Cp * Cp) * 2 + 4 * Cp * 4
    vmem_limit = int(min(max(2 * vmem_needed, 4 << 20), 60 << 20))

    out_p = pl.pallas_call(
        _make_block_kernel(L, NL),
        out_shape=jax.ShapeDtypeStruct((NL, Cp), x_ncl.dtype),
        in_specs=[pl.BlockSpec(memory_space=pltpu.MemorySpace.VMEM)] * 5,
        out_specs=pl.BlockSpec(memory_space=pltpu.MemorySpace.VMEM),
        compiler_params=pltpu.CompilerParams(vmem_limit_bytes=vmem_limit),
        cost_estimate=pl.CostEstimate(flops=flops,
                                      transcendentals=transcendentals,
                                      bytes_accessed=bytes_accessed),
    )(x_p, w1k, w2k, g_p, b_p)

    out_nlc = out_p[:, :C].reshape(N, L, C)
    return jnp.transpose(out_nlc, (0, 2, 1))                        # back to NCL


def reference_forward(x, w1, w2, gamma, beta):
    """Pure-JAX f32 reference mirroring the PyTorch module (for verification)."""
    def conv(h, w):
        return jax.lax.conv_general_dilated(
            h, w, window_strides=(1,), padding=((1, 1),),
            dimension_numbers=("NCH", "OIH", "NCH"))

    def bn(h):
        mean = jnp.mean(h, axis=(0, 2), keepdims=True)
        var = jnp.mean((h - mean) ** 2, axis=(0, 2), keepdims=True)
        return (gamma[None, :, None] * (h - mean) / jnp.sqrt(var + EPS)
                + beta[None, :, None])

    identity = x
    h = jax.nn.relu(bn(conv(x, w1)))
    h = bn(conv(h, w2))
    return jax.nn.relu(h + identity)


if __name__ == "__main__":
    # Small shapes consistent with the module: stride=1, no downsample,
    # in_channels == out_channels so the residual add is valid.
    N, C, L = 2, 8, 16

    key = jax.random.PRNGKey(0)
    kx, kw1, kw2, kg, kb = jax.random.split(key, 5)
    x = jax.random.normal(kx, (N, C, L), dtype=jnp.float32)
    w1 = jax.random.normal(kw1, (C, C, 3), dtype=jnp.float32) * 0.2   # conv1 weight
    w2 = jax.random.normal(kw2, (C, C, 3), dtype=jnp.float32) * 0.2   # conv2 weight
    # batch_norm2 affine params (batch_norm1 params exist in __init__ but are
    # never used by forward(), so they are not materialized here).
    gamma = 1.0 + 0.1 * jax.random.normal(kg, (C,), dtype=jnp.float32)
    beta = 0.1 * jax.random.normal(kb, (C,), dtype=jnp.float32)

    out = jax.block_until_ready(block_forward(x, w1, w2, gamma, beta))

    ref = jax.block_until_ready(reference_forward(x, w1, w2, gamma, beta))
    assert out.shape == (N, C, L)
    # bf16 MXU inputs (f32 accumulation) -> relaxed tolerance vs the f32 reference.
    assert jnp.max(jnp.abs(out - ref)) < 5e-2, "mismatch vs pure-JAX reference"

    print("KERNEL_OK")
</pallas_src>

<mosaic_0001>
module attributes {stable_mosaic.version = 11 : i64} {
  func.func @kernel(%arg0: memref<32x128xf32, #tpu.memory_space<vmem>>, %arg1: memref<384x128xbf16, #tpu.memory_space<vmem>>, %arg2: memref<384x128xbf16, #tpu.memory_space<vmem>>, %arg3: memref<1x128xf32, #tpu.memory_space<vmem>>, %arg4: memref<1x128xf32, #tpu.memory_space<vmem>>, %arg5: memref<32x128xf32, #tpu.memory_space<vmem>>) attributes {dimension_semantics = [], scalar_prefetch = 0 : i64, scratch_operands = 0 : i64, tpu.core_type = #tpu.core_type<tc>} {
    %c0 = arith.constant 0 : index
    %c0_0 = arith.constant 0 : index
    %0 = vector.load %arg0[%c0, %c0_0] : memref<32x128xf32, #tpu.memory_space<vmem>>, vector<32x128xf32>
    %c0_1 = arith.constant 0 : index
    %c0_2 = arith.constant 0 : index
    %1 = vector.load %arg1[%c0_1, %c0_2] : memref<384x128xbf16, #tpu.memory_space<vmem>>, vector<384x128xbf16>
    %c0_3 = arith.constant 0 : index
    %c0_4 = arith.constant 0 : index
    %2 = vector.load %arg2[%c0_3, %c0_4] : memref<384x128xbf16, #tpu.memory_space<vmem>>, vector<384x128xbf16>
    %c0_5 = arith.constant 0 : index
    %c0_6 = arith.constant 0 : index
    %3 = vector.load %arg3[%c0_5, %c0_6] : memref<1x128xf32, #tpu.memory_space<vmem>>, vector<1x128xf32>
    %c0_7 = arith.constant 0 : index
    %c0_8 = arith.constant 0 : index
    %4 = vector.load %arg4[%c0_7, %c0_8] : memref<1x128xf32, #tpu.memory_space<vmem>>, vector<1x128xf32>
    %5 = tpu.iota {dimensions = array<i32: 0>} : vector<32x1xi32>
    %c16_i32 = arith.constant 16 : i32
    %c0_i32 = arith.constant 0 : i32
    %6 = arith.cmpi eq, %c16_i32, %c0_i32 : i32
    %c1_i32 = arith.constant 1 : i32
    %7 = arith.select %6, %c1_i32, %c16_i32 : i32
    %8 = vector.broadcast %7 : i32 to vector<32x1xi32>
    %9 = arith.remsi %5, %8 : vector<32x1xi32>
    %c0_i32_9 = arith.constant 0 : i32
    %10 = vector.broadcast %c0_i32_9 : i32 to vector<32x1xi32>
    %11 = arith.cmpi ne, %9, %10 : vector<32x1xi32>
    %c0_i32_10 = arith.constant 0 : i32
    %12 = vector.broadcast %c0_i32_10 : i32 to vector<32x1xi32>
    %13 = arith.cmpi slt, %9, %12 : vector<32x1xi32>
    %c0_i32_11 = arith.constant 0 : i32
    %14 = arith.cmpi slt, %7, %c0_i32_11 : i32
    %15 = vector.broadcast %14 : i1 to vector<32x1xi1>
    %16 = vector.broadcast %15 : vector<32x1xi1> to vector<32x1xi1>
    %17 = arith.xori %13, %16 : vector<32x1xi1>
    %18 = arith.andi %17, %11 : vector<32x1xi1>
    %19 = vector.broadcast %7 : i32 to vector<32x1xi32>
    %20 = arith.addi %9, %19 : vector<32x1xi32>
    %21 = arith.select %18, %20, %9 : vector<32x1xi1>, vector<32x1xi32>
    %c0_i32_12 = arith.constant 0 : i32
    %22 = vector.broadcast %c0_i32_12 : i32 to vector<32x1xi32>
    %23 = arith.cmpi ne, %21, %22 : vector<32x1xi32>
    %c16_i32_13 = arith.constant 16 : i32
    %c0_i32_14 = arith.constant 0 : i32
    %24 = arith.cmpi eq, %c16_i32_13, %c0_i32_14 : i32
    %c1_i32_15 = arith.constant 1 : i32
    %25 = arith.select %24, %c1_i32_15, %c16_i32_13 : i32
    %26 = vector.broadcast %25 : i32 to vector<32x1xi32>
    %27 = arith.remsi %5, %26 : vector<32x1xi32>
    %c0_i32_16 = arith.constant 0 : i32
    %28 = vector.broadcast %c0_i32_16 : i32 to vector<32x1xi32>
    %29 = arith.cmpi ne, %27, %28 : vector<32x1xi32>
    %c0_i32_17 = arith.constant 0 : i32
    %30 = vector.broadcast %c0_i32_17 : i32 to vector<32x1xi32>
    %31 = arith.cmpi slt, %27, %30 : vector<32x1xi32>
    %c0_i32_18 = arith.constant 0 : i32
    %32 = arith.cmpi slt, %25, %c0_i32_18 : i32
    %33 = vector.broadcast %32 : i1 to vector<32x1xi1>
    %34 = vector.broadcast %33 : vector<32x1xi1> to vector<32x1xi1>
    %35 = arith.xori %31, %34 : vector<32x1xi1>
    %36 = arith.andi %35, %29 : vector<32x1xi1>
    %37 = vector.broadcast %25 : i32 to vector<32x1xi32>
    %38 = arith.addi %27, %37 : vector<32x1xi32>
    %39 = arith.select %36, %38, %27 : vector<32x1xi1>, vector<32x1xi32>
    %c15_i32 = arith.constant 15 : i32
    %40 = vector.broadcast %c15_i32 : i32 to vector<32x1xi32>
    %41 = arith.cmpi ne, %39, %40 : vector<32x1xi32>
    %c1_i32_19 = arith.constant 1 : i32
    %42 = tpu.dynamic_rotate %0 by %c1_i32_19 dim 0 : vector<32x128xf32>, i32 -> vector<32x128xf32>
    %cst = arith.constant 0.000000e+00 : f32
    %43 = vector.shape_cast %23 : vector<32x1xi1> to vector<32x1xi1>
    %44 = vector.broadcast %43 : vector<32x1xi1> to vector<32x128xi1>
    %45 = vector.broadcast %cst : f32 to vector<32x128xf32>
    %46 = arith.select %44, %42, %45 : vector<32x128xi1>, vector<32x128xf32>
    %c31_i32 = arith.constant 31 : i32
    %47 = tpu.dynamic_rotate %0 by %c31_i32 dim 0 : vector<32x128xf32>, i32 -> vector<32x128xf32>
    %cst_20 = arith.constant 0.000000e+00 : f32
    %48 = vector.shape_cast %41 : vector<32x1xi1> to vector<32x1xi1>
    %49 = vector.broadcast %48 : vector<32x1xi1> to vector<32x128xi1>
    %50 = vector.broadcast %cst_20 : f32 to vector<32x128xf32>
    %51 = arith.select %49, %47, %50 : vector<32x128xi1>, vector<32x128xf32>
    %52 = arith.truncf %46 : vector<32x128xf32> to vector<32x128xbf16>
    %53 = arith.truncf %0 : vector<32x128xf32> to vector<32x128xbf16>
    %54 = arith.truncf %51 : vector<32x128xf32> to vector<32x128xbf16>
    %55 = tpu.concatenate %52, %53, %54 in 1 : vector<32x128xbf16>, vector<32x128xbf16>, vector<32x128xbf16> -> vector<32x384xbf16>
    %cst_21 = arith.constant dense<0.000000e+00> : vector<32x128xf32>
    %56 = tpu.matmul %55, %1, %cst_21 {dimension_numbers = #tpu.dot_dimension_numbers<[1], [0], [0], [1], [0, 0, 1, 1], [], []>} : vector<32x384xbf16>, vector<384x128xbf16>, vector<32x128xf32> -> vector<32x128xf32>
    %cst_22 = arith.constant dense<0.000000e+00> : vector<128xf32>
    %57 = vector.multi_reduction <add>, %56, %cst_22 [0] : vector<32x128xf32> to vector<128xf32>
    %58 = vector.shape_cast %57 : vector<128xf32> to vector<1x128xf32>
    %59 = arith.mulf %56, %56 : vector<32x128xf32>
    %cst_23 = arith.constant dense<0.000000e+00> : vector<128xf32>
    %60 = vector.multi_reduction <add>, %59, %cst_23 [0] : vector<32x128xf32> to vector<128xf32>
    %61 = vector.shape_cast %60 : vector<128xf32> to vector<1x128xf32>
    %cst_24 = arith.constant 3.125000e-02 : f32
    %62 = vector.broadcast %cst_24 : f32 to vector<1x128xf32>
    %63 = arith.mulf %58, %62 : vector<1x128xf32>
    %cst_25 = arith.constant 3.125000e-02 : f32
    %64 = vector.broadcast %cst_25 : f32 to vector<1x128xf32>
    %65 = arith.mulf %61, %64 : vector<1x128xf32>
    %66 = arith.mulf %63, %63 : vector<1x128xf32>
    %67 = arith.subf %65, %66 : vector<1x128xf32>
    %cst_26 = arith.constant 0.000000e+00 : f32
    %68 = vector.broadcast %cst_26 : f32 to vector<1x128xf32>
    %69 = arith.maximumf %67, %68 : vector<1x128xf32>
    %cst_27 = arith.constant 9.99999974E-6 : f32
    %70 = vector.broadcast %cst_27 : f32 to vector<1x128xf32>
    %71 = arith.addf %69, %70 : vector<1x128xf32>
    %72 = math.rsqrt %71 : vector<1x128xf32>
    %73 = arith.mulf %3, %72 : vector<1x128xf32>
    %74 = arith.mulf %63, %73 : vector<1x128xf32>
    %75 = arith.subf %4, %74 : vector<1x128xf32>
    %76 = vector.broadcast %73 : vector<1x128xf32> to vector<32x128xf32>
    %77 = arith.mulf %56, %76 : vector<32x128xf32>
    %78 = vector.broadcast %75 : vector<1x128xf32> to vector<32x128xf32>
    %79 = arith.addf %77, %78 : vector<32x128xf32>
    %cst_28 = arith.constant 0.000000e+00 : f32
    %80 = vector.broadcast %cst_28 : f32 to vector<32x128xf32>
    %81 = arith.maximumf %79, %80 : vector<32x128xf32>
    %c1_i32_29 = arith.constant 1 : i32
    %82 = tpu.dynamic_rotate %81 by %c1_i32_29 dim 0 : vector<32x128xf32>, i32 -> vector<32x128xf32>
    %cst_30 = arith.constant 0.000000e+00 : f32
    %83 = vector.shape_cast %23 : vector<32x1xi1> to vector<32x1xi1>
    %84 = vector.broadcast %83 : vector<32x1xi1> to vector<32x128xi1>
    %85 = vector.broadcast %cst_30 : f32 to vector<32x128xf32>
    %86 = arith.select %84, %82, %85 : vector<32x128xi1>, vector<32x128xf32>
    %c31_i32_31 = arith.constant 31 : i32
    %87 = tpu.dynamic_rotate %81 by %c31_i32_31 dim 0 : vector<32x128xf32>, i32 -> vector<32x128xf32>
    %cst_32 = arith.constant 0.000000e+00 : f32
    %88 = vector.shape_cast %41 : vector<32x1xi1> to vector<32x1xi1>
    %89 = vector.broadcast %88 : vector<32x1xi1> to vector<32x128xi1>
    %90 = vector.broadcast %cst_32 : f32 to vector<32x128xf32>
    %91 = arith.select %89, %87, %90 : vector<32x128xi1>, vector<32x128xf32>
    %92 = arith.truncf %86 : vector<32x128xf32> to vector<32x128xbf16>
    %93 = arith.truncf %81 : vector<32x128xf32> to vector<32x128xbf16>
    %94 = arith.truncf %91 : vector<32x128xf32> to vector<32x128xbf16>
    %95 = tpu.concatenate %92, %93, %94 in 1 : vector<32x128xbf16>, vector<32x128xbf16>, vector<32x128xbf16> -> vector<32x384xbf16>
    %cst_33 = arith.constant dense<0.000000e+00> : vector<32x128xf32>
    %96 = tpu.matmul %95, %2, %cst_33 {dimension_numbers = #tpu.dot_dimension_numbers<[1], [0], [0], [1], [0, 0, 1, 1], [], []>} : vector<32x384xbf16>, vector<384x128xbf16>, vector<32x128xf32> -> vector<32x128xf32>
    %cst_34 = arith.constant dense<0.000000e+00> : vector<128xf32>
    %97 = vector.multi_reduction <add>, %96, %cst_34 [0] : vector<32x128xf32> to vector<128xf32>
    %98 = vector.shape_cast %97 : vector<128xf32> to vector<1x128xf32>
    %99 = arith.mulf %96, %96 : vector<32x128xf32>
    %cst_35 = arith.constant dense<0.000000e+00> : vector<128xf32>
    %100 = vector.multi_reduction <add>, %99, %cst_35 [0] : vector<32x128xf32> to vector<128xf32>
    %101 = vector.shape_cast %100 : vector<128xf32> to vector<1x128xf32>
    %cst_36 = arith.constant 3.125000e-02 : f32
    %102 = vector.broadcast %cst_36 : f32 to vector<1x128xf32>
    %103 = arith.mulf %98, %102 : vector<1x128xf32>
    %cst_37 = arith.constant 3.125000e-02 : f32
    %104 = vector.broadcast %cst_37 : f32 to vector<1x128xf32>
    %105 = arith.mulf %101, %104 : vector<1x128xf32>
    %106 = arith.mulf %103, %103 : vector<1x128xf32>
    %107 = arith.subf %105, %106 : vector<1x128xf32>
    %cst_38 = arith.constant 0.000000e+00 : f32
    %108 = vector.broadcast %cst_38 : f32 to vector<1x128xf32>
    %109 = arith.maximumf %107, %108 : vector<1x128xf32>
    %cst_39 = arith.constant 9.99999974E-6 : f32
    %110 = vector.broadcast %cst_39 : f32 to vector<1x128xf32>
    %111 = arith.addf %109, %110 : vector<1x128xf32>
    %112 = math.rsqrt %111 : vector<1x128xf32>
    %113 = arith.mulf %3, %112 : vector<1x128xf32>
    %114 = arith.mulf %103, %113 : vector<1x128xf32>
    %115 = arith.subf %4, %114 : vector<1x128xf32>
    %116 = vector.broadcast %113 : vector<1x128xf32> to vector<32x128xf32>
    %117 = arith.mulf %96, %116 : vector<32x128xf32>
    %118 = vector.broadcast %115 : vector<1x128xf32> to vector<32x128xf32>
    %119 = arith.addf %117, %118 : vector<32x128xf32>
    %120 = arith.addf %119, %0 : vector<32x128xf32>
    %cst_40 = arith.constant 0.000000e+00 : f32
    %121 = vector.broadcast %cst_40 : f32 to vector<32x128xf32>
    %122 = arith.maximumf %120, %121 : vector<32x128xf32>
    %c0_41 = arith.constant 0 : index
    %c0_42 = arith.constant 0 : index
    %123 = vector.load %arg5[%c0_41, %c0_42] : memref<32x128xf32, #tpu.memory_space<vmem>>, vector<32x128xf32>
    tpu.vector_store %arg5[%c0_41, %c0_42], %122 {strides = array<i32>} : memref<32x128xf32, #tpu.memory_space<vmem>>, vector<32x128xf32>,
    return
  }
}

</mosaic_0001>

<bundles_post_ra>
// kernel: tpu_custom_call.1
= control target key start
LH: loop header
LB: loop body
LE: loop exit
PB: predicated region body
PF: predicated region fallthrough
CT: control target
= control target key end

     0   :  { %10 = vsyncpa [#allocation3], 0  ;;  %s1507_s0 = inlined_call_operand.hbm [shape: f32[32,128], index: 0, kind: input, shape index: {}]   ;;  %s1508_s1 = inlined_call_operand.hbm [shape: bf16[384,128], index: 1, kind: input, shape index: {}]   ;;  %s1509_s2 = inlined_call_operand.hbm [shape: bf16[384,128], index: 2, kind: input, shape index: {}]   ;;  %s1510_s3 = inlined_call_operand.vmem [shape: f32[1,128], index: 3, kind: input, shape index: {}]   ;;  %s1511_s4 = inlined_call_operand.vmem [shape: f32[1,128], index: 4, kind: input, shape index: {}]   ;;  %s1512_s5 = inlined_call_operand.hbm [shape: f32[32,128], index: 5, kind: output, shape index: {}]  }
   0x1   :  { %11 = vsyncpa [#allocation6], 0 }
   0x2   :  { %12 = vsyncpa [#allocation4], 0  ;;  %s1269_s18 = smov [#allocation5]   ;;  %s1175_s22 = scalar_lea.hbm %s1508_s1, 3072 }
   0x3   :  { %s30_s19 = sshll.u32 %s1269_s18, 4  ;;  %p1176_p0 = scmp.ne.s32.totalorder %s1508_s1, %s1175_s22  ;;  %s31_s19 = int_to_ptr.vmem [resolvable:$true] %s30_s19 }
   0x4   :  { %p1179_p1 = scmp.lt.u32.totalorder %s1175_s22, %s1508_s1 }
   0x6   :  { %p1181_p2 = pnand %p1179_p1, %p1176_p0 }
   0x8   :  { %1184 = shalt.err (!%p1181_p2)
}
   0x9   :  { %s1185_s27 = scalar_lea.vmem %s31_s19, 3072  ;;  %p1190_p4 = scmp.lt.s32.totalorder %s31_s19, %s31_s19 }
   0xa   :  { %p1186_p3 = scmp.ne.s32.totalorder %s31_s19, %s1185_s27  ;;  %p1191_p5 = scmp.lt.s32.totalorder %s1185_s27, %s1185_s27 }
   0xc   :  { %p1192_p6 = por %p1191_p5, %p1190_p4 }
   0xe   :  { %p1193_p7 = pnand %p1192_p6, %p1186_p3 }
  0x10   :  { %1196 = shalt.err (!%p1193_p7)
}
  0x11   :  { %s1270_s28 = smov 64   ;;  %s1271_s29 = smov 4  }
  0x12   :  { %36 = dma.hbm_to_vmem [thread:$0]  %s1508_s1, 3072, %s31_s19, [#allocation6], %s1270_s28, %s1270_s28, %s1271_s29  }
  0x13   :  { %s1272_s7 = smov [#allocation2]   ;;  %s1197_s11 = scalar_lea.hbm %s1507_s0, 512 }
  0x14   :  { %s18_s8 = sshll.u32 %s1272_s7, 4  ;;  %p1198_p8 = scmp.ne.s32.totalorder %s1507_s0, %s1197_s11  ;;  %s19_s8 = int_to_ptr.vmem [resolvable:$true] %s18_s8 }
  0x15   :  { %p1201_p9 = scmp.lt.u32.totalorder %s1197_s11, %s1507_s0 }
  0x17   :  { %p1203_p10 = pnand %p1201_p9, %p1198_p8 }
  0x19   :  { %1206 = shalt.err (!%p1203_p10)
}
  0x1a   :  { %s1207_s16 = scalar_lea.vmem %s19_s8, 512  ;;  %p1212_p12 = scmp.lt.s32.totalorder %s19_s8, %s19_s8 }
  0x1b   :  { %p1208_p11 = scmp.ne.s32.totalorder %s19_s8, %s1207_s16  ;;  %p1213_p13 = scmp.lt.s32.totalorder %s1207_s16, %s1207_s16 }
  0x1d   :  { %p1214_p0 = por %p1213_p13, %p1212_p12 }
  0x1f   :  { %p1215_p1 = pnand %p1214_p0, %p1208_p11 }
  0x21   :  { %1218 = shalt.err (!%p1215_p1)
}
  0x22   :  { %s1273_s1 = smov 128   ;;  %s1274_s17 = smov 8  }
  0x23   :  { %24 = dma.hbm_to_vmem [thread:$0]  %s1507_s0, 512, %s19_s8, [#allocation3], %s1273_s1, %s1273_s1, %s1274_s17  }
  0x24   :  { %s1275_s20 = smov [#allocation7]   ;;  %s1219_s24 = scalar_lea.hbm %s1509_s2, 3072 }
  0x25   :  { %s42_s21 = sshll.u32 %s1275_s20, 4  ;;  %p1220_p2 = scmp.ne.s32.totalorder %s1509_s2, %s1219_s24  ;;  %s43_s21 = int_to_ptr.vmem [resolvable:$true] %s42_s21 }
  0x26   :  { %p1223_p3 = scmp.lt.u32.totalorder %s1219_s24, %s1509_s2 }
  0x28   :  { %p1225_p4 = pnand %p1223_p3, %p1220_p2 }
  0x2a   :  { %1228 = shalt.err (!%p1225_p4)
}
  0x2b   :  { %s1229_s6 = scalar_lea.vmem %s43_s21, 3072  ;;  %p1234_p6 = scmp.lt.s32.totalorder %s43_s21, %s43_s21 }
  0x2c   :  { %p1230_p5 = scmp.ne.s32.totalorder %s43_s21, %s1229_s6  ;;  %p1235_p7 = scmp.lt.s32.totalorder %s1229_s6, %s1229_s6 }
  0x2e   :  { %p1236_p8 = por %p1235_p7, %p1234_p6 }
  0x30   :  { %p1237_p9 = pnand %p1236_p8, %p1230_p5 }
  0x32   :  { %1240 = shalt.err (!%p1237_p9)
}
  0x33   :  { %48 = dma.hbm_to_vmem [thread:$0]  %s1509_s2, 3072, %s43_s21, [#allocation6], %s1270_s28, %s1270_s28, %s1271_s29  }
  0x34   :  { %1263 = dma.done.wait [#allocation3], 512  }
  0x35   :  { %1264 = vsyncadd [#allocation3], 4294966784 }
  0x36   :  { %1265 = dma.done.wait [#allocation6], 6144  }
  0x37   :  { %1266 = vsyncadd [#allocation6], 4294961152  ;;  %v1123_v0 = vld [vmem:[#allocation5 + $0x40] sm:$0xff]   ;;  %v1126_v3 = vld [vmem:[#allocation5 + $0x48] sm:$0xff]   ;;  %v165_v8 = vlaneseq  ;;  %vm1276_vm5 = vmmov 1  }
  0x38   :  { %v1124_v1 = vld [vmem:[#allocation5] sm:$0xff]   ;;  %998 = vmatprep.subr.bf16.mxu0 %v1123_v0  ;;  %v1127_v4 = vld [vmem:[#allocation5 + $0x8] sm:$0xff]   ;;  %v1129_v6 = vld [vmem:[#allocation5 + $0x50] sm:$0xff]  }
  0x39   :  { %v1125_v2 = vld [vmem:[#allocation5 + $0x80] sm:$0xff]   ;;  %999 = vmatpush3.bf16.msra.mxu0 %v1124_v1  ;;  %v1128_v5 = vld [vmem:[#allocation5 + $0x88] sm:$0xff]   ;;  %v1130_v7 = vld [vmem:[#allocation5 + $0x10] sm:$0xff]   ;;  %v1353_v13 = vshrl.u32 %v165_v8, 7 }
  0x3a   :  { %1074 = vmatprep.subr.bf16.mxu1 %v1125_v2  ;;  %1000 = vmatprep.subr.bf16.mxu0 %v1126_v3  ;;  %v1131_v9 = vld [vmem:[#allocation5 + $0x90] sm:$0xff]   ;;  %v1132_v10 = vld [vmem:[#allocation5 + $0x58] sm:$0xff]   ;;  %v1135_v14 = vld [vmem:[#allocation5 + $0x60] sm:$0xff]  }
  0x3b   :  { %1075 = vmatpush3.bf16.msra.mxu1 %v1125_v2  ;;  %v1133_v11 = vld [vmem:[#allocation5 + $0x18] sm:$0xff]   ;;  %v1137_v15 = vld [vmem:[#allocation5 + $0xa0] sm:$0xff]   ;;  %v167_v17 = vadd.s32 8, %v1353_v13  ;;  %v1138_v18 = vld [vmem:[#allocation5 + $0x68] sm:$0xff]   ;;  %v169_v19 = vadd.s32 24, %v1353_v13  ;;  %v174_v20 = vand.u32 15, %v1353_v13 }
  0x3c   :  { %1076 = vmatprep.subr.bf16.mxu1 %v1128_v5  ;;  %v1134_v12 = vld [vmem:[#allocation5 + $0x98] sm:$0xff]   ;;  %v1136_v16 = vld [vmem:[#allocation5 + $0x20] sm:$0xff]   ;;  %v1140_v21 = vld [vmem:[#allocation5 + $0xa8] sm:$0xff]   ;;  %v168_v22 = vadd.s32 16, %v1353_v13  ;;  %vm230_vm0 = vcmp.lt.s32.totalorder %v1353_v13, 1  ;;  %vm251_vm1 = vcmp.lt.s32.totalorder %v1353_v13, 7 }
  0x3d   :  { %1001 = vmatpush3.bf16.msra.mxu0 %v1127_v4  ;;  %v1139_v23 = vld [vmem:[#allocation5 + $0x28] sm:$0xff]   ;;  %v181_v24 = vand.u32 15, %v167_v17  ;;  %v1141_v25 = vld [vmem:[#allocation5 + $0x70] sm:$0xff]   ;;  %v195_v26 = vand.u32 15, %v169_v19  ;;  %v1144_v29 = vld [vmem:[#allocation5 + $0x78] sm:$0xff]   ;;  %vm1361_vm2 = vcmp.ne.s32.totalorder %v174_v20, 0 }
  0x3e   :  { %1002 = vmatprep.subr.bf16.mxu0 %v1129_v6  ;;  %v1142_v27 = vld [vmem:[#allocation5 + $0x30] sm:$0xff]   ;;  %v1146_v31 = vld [vmem:[#allocation5 + $0xb8] sm:$0xff]   ;;  %v1365_v32 = vld [vmem:[#allocation2] sm:$0xff]  ;;  %v188_v37 = vand.u32 15, %v168_v22 }
  0x3f   :  { %1077 = vmatpush3.bf16.msra.mxu1 %v1128_v5  ;;  %v1143_v28 = vld [vmem:[#allocation5 + $0xb0] sm:$0xff]   ;;  %v1367_v33 = vld [vmem:[#allocation2 + $0x8] sm:$0xff]  ;;  %v1369_v34 = vld [vmem:[#allocation2 + $0x18] sm:$0xff]  ;;  %vm1371_vm3 = vcmp.ne.s32.totalorder %v181_v24, 15  ;;  %vm1375_vm4 = vcmp.ne.s32.totalorder %v195_v26, 15  ;;  %v226_v39 = vrot.slane %v1365_v32, 7 }
  0x40   :  { %1078 = vmatprep.subr.bf16.mxu1 %v1131_v9  ;;  %v1145_v38 = vld [vmem:[#allocation5 + $0x38] sm:$0xff]   ;;  %v227_v40 = vrot.slane %v1367_v33, 7  ;;  %v270_v41 = vpack.c.bf16 %v1367_v33, %v1365_v32  ;;  %v229_v42 = vrot.slane %v1369_v34, 7  ;;  %v1384_v43 = vld [vmem:[#allocation2 + $0x10] sm:$0xff]  ;;  %vm1389_vm6 = vmpackc.low %vm1276_vm5, %vm1361_vm2  ;;  %v247_v45 = vrot.slane %v1365_v32, 1 }
  0x41   :  { %1003 = vmatpush3.bf16.msra.mxu0 %v1130_v7  ;;  %v248_v46 = vrot.slane %v1367_v33, 1  ;;  %v249_v47 = vrot.slane %v1384_v43, 1  ;;  %v250_v48 = vrot.slane %v1369_v34, 1  ;;  %vm1404_vm7 = vmpackc.low %vm1371_vm3, %vm1276_vm5  ;;  %vm220_vm9 = vcmp.ne.s32.totalorder %v188_v37, 0  ;;  %v1147_v2 = vld [vmem:[#allocation7 + $0x40] sm:$0xff]   ;;  %v1150_v5 = vld [vmem:[#allocation7 + $0x48] sm:$0xff]  }
  0x42   :  { %1004 = vmatprep.subr.bf16.mxu0 %v1132_v10  ;;  %450 = vmatprep.mubr.bf16.mxu0 %v270_v41  ;;  %v233_v49 = vsel %vm230_vm0, %v226_v39, %v227_v40  ;;  %v234_v50 = vsel %vm230_vm0, %v229_v42, %v226_v39  ;;  %vm1415_vm8 = vmpackc.low %vm1375_vm4, %vm1276_vm5  ;;  %v228_v55 = vrot.slane %v1384_v43, 7  ;;  %v271_v60 = vpack.c.bf16 %v1369_v34, %v1384_v43  ;;  %v1148_v3 = vld [vmem:[#allocation7] sm:$0xff]   ;;  %v1151_v6 = vld [vmem:[#allocation7 + $0x8] sm:$0xff]  }
  0x43   :  { %1079 = vmatpush3.bf16.msra.mxu1 %v1131_v9  ;;  %v253_v52 = vsel %vm251_vm1, %v248_v46, %v249_v47  ;;  %v254_v53 = vsel %vm251_vm1, %v247_v45, %v248_v46  ;;  %v252_v57 = vsel %vm251_vm1, %v249_v47, %v250_v48  ;;  %v255_v58 = vsel %vm251_vm1, %v250_v48, %v247_v45  ;;  %vm1429_vm10 = vmpackc.low %vm1276_vm5, %vm220_vm9  ;;  %v1149_v4 = vld [vmem:[#allocation7 + $0x80] sm:$0xff]   ;;  %v1152_v7 = vld [vmem:[#allocation7 + $0x88] sm:$0xff]  }
  0x44   :  { %1080 = vmatprep.subr.bf16.mxu1 %v1134_v12  ;;  %v957_v56 = vpack.c.bf16 %v253_v52, %v254_v53  ;;  %v951_v59 = vpack.c.bf16 %v233_v49, %v234_v50  ;;  %v960_v62 = vpack.c.bf16 %v255_v58, %v252_v57  ;;  %v231_v63 = vsel %vm230_vm0, %v228_v55, %v229_v42  ;;  %v1153_v8 = vld [vmem:[#allocation7 + $0x50] sm:$0xff]   ;;  %v1161_v17 = vld [vmem:[#allocation7 + $0xa0] sm:$0xff]   ;;  %v1163_v19 = vld [vmem:[#allocation7 + $0x28] sm:$0xff]  }
  0x45   :  { %1005 = vmatpush3.bf16.msra.mxu0 %v1133_v11  ;;  %v232_v0 = vsel %vm230_vm0, %v227_v40, %v228_v55  ;;  %v1154_v9 = vld [vmem:[#allocation7 + $0x10] sm:$0xff]   ;;  %v1156_v11 = vld [vmem:[#allocation7 + $0x58] sm:$0xff]   ;;  %v1164_v20 = vld [vmem:[#allocation7 + $0xa8] sm:$0xff]  }
  0x46   :  { %1006 = vmatprep.subr.bf16.mxu0 %v1135_v14  ;;  %1090 = vmatprep.mubr.msk.bf16.mxu1 %vm1404_vm7, %v957_v56  ;;  %v954_v1 = vpack.c.bf16 %v231_v63, %v232_v0  ;;  %v1155_v10 = vld [vmem:[#allocation7 + $0x90] sm:$0xff]   ;;  %v1158_v14 = vld [vmem:[#allocation7 + $0x98] sm:$0xff]  }
  0x47   :  { %1081 = vmatpush3.bf16.msra.mxu1 %v1134_v12  ;;  %v1157_v12 = vld [vmem:[#allocation7 + $0x18] sm:$0xff]   ;;  %v1166_v22 = vld [vmem:[#allocation7 + $0x30] sm:$0xff]  }
  0x48   :  { %1082 = vmatprep.subr.bf16.mxu1 %v1137_v15  ;;  %v1168_v24 = vld [vmem:[#allocation7 + $0x78] sm:$0xff]  }
  0x49   :  { %1007 = vmatpush3.bf16.msra.mxu0 %v1136_v16  ;;  %v1160_v16 = vld [vmem:[#allocation7 + $0x20] sm:$0xff]   ;;  %v1170_v26 = vld [vmem:[#allocation7 + $0xb8] sm:$0xff]  }
  0x4a   :  { %1008 = vmatprep.subr.bf16.mxu0 %v1138_v18  ;;  %v1162_v18 = vld [vmem:[#allocation7 + $0x68] sm:$0xff]  }
  0x4b   :  { %1083 = vmatpush3.bf16.msra.mxu1 %v1137_v15  ;;  %v1159_v15 = vld [vmem:[#allocation7 + $0x60] sm:$0xff]  }
  0x4c   :  { %1084 = vmatprep.subr.bf16.mxu1 %v1140_v21 }
  0x4d   :  { %1009 = vmatpush3.bf16.msra.mxu0 %v1139_v23  ;;  %v1167_v23 = vld [vmem:[#allocation7 + $0xb0] sm:$0xff]  }
  0x4e   :  { %1010 = vmatprep.subr.bf16.mxu0 %v1141_v25  ;;  %v1169_v25 = vld [vmem:[#allocation7 + $0x38] sm:$0xff]  }
  0x4f   :  { %1085 = vmatpush3.bf16.msra.mxu1 %v1140_v21  ;;  %v1165_v21 = vld [vmem:[#allocation7 + $0x70] sm:$0xff]  }
  0x50   :  { %1086 = vmatprep.subr.bf16.mxu1 %v1143_v28 }
  0x51   :  { %1011 = vmatpush3.bf16.msra.mxu0 %v1142_v27 }
  0x52   :  { %1012 = vmatprep.subr.bf16.mxu0 %v1144_v29 }
  0x53   :  { %1087 = vmatpush3.bf16.msra.mxu1 %v1143_v28 }
  0x54   :  { %1088 = vmatprep.subr.bf16.mxu1 %v1146_v31 }
  0x55   :  { %1013 = vmatpush3.bf16.msra.mxu0 %v1145_v38 }
  0x56   :  { %1036 = vmatprep.subr.bf16.mxu0 %v1147_v2 }
  0x57   :  { %1089 = vmatpush3.bf16.msra.mxu1 %v1146_v31 }
  0x58   :  { %952 = vmatmul.mubr.msk.bf16.vlgmr.msra.gmra.mrb[0].mxu0 %vm1389_vm6, %v951_v59  ;;  %1094 = vmatprep.subr.bf16.mxu1 %v1149_v4 }
  0x59   :  { %458 = vmatprep.mubr.bf16.mxu0 %v271_v60  ;;  %1037 = vmatpush3.bf16.msra.mxu0 %v1148_v3 }
  0x5a   :  { %1091 = vmatmul.mubr.msk.bf16.vlgmr.msra.gmra.mrb[0].mxu1 %vm1415_vm8, %v960_v62  ;;  %1038 = vmatprep.subr.bf16.mxu0 %v1150_v5 }
  0x5b   :  { %1095 = vmatpush3.bf16.msra.mxu1 %v1149_v4 }
  0x5c   :  { %1096 = vmatprep.subr.bf16.mxu1 %v1152_v7 }
  0x5d   :  { %1039 = vmatpush3.bf16.msra.mxu0 %v1151_v6 }
  0x5e   :  { %1040 = vmatprep.subr.bf16.mxu0 %v1153_v8 }
  0x5f   :  { %1097 = vmatpush3.bf16.msra.mxu1 %v1152_v7 }
  0x60   :  { %955 = vmatmul.mubr.msk.bf16.gmra.mrb[4].mxu0 %vm1429_vm10, %v954_v1  ;;  %1098 = vmatprep.subr.bf16.mxu1 %v1155_v10 }
  0x61   :  { %1041 = vmatpush3.bf16.msra.mxu0 %v1154_v9 }
  0x62   :  { %1042 = vmatprep.subr.bf16.mxu0 %v1156_v11 }
  0x63   :  { %1099 = vmatpush3.bf16.msra.mxu1 %v1155_v10 }
  0x64   :  { %1100 = vmatprep.subr.bf16.mxu1 %v1158_v14 }
  0x65   :  { %1043 = vmatpush3.bf16.msra.mxu0 %v1157_v12 }
  0x66   :  { %1044 = vmatprep.subr.bf16.mxu0 %v1159_v15 }
  0x67   :  { %1101 = vmatpush3.bf16.msra.mxu1 %v1158_v14 }
  0x68   :  { %1102 = vmatprep.subr.bf16.mxu1 %v1161_v17 }
  0x69   :  { %1045 = vmatpush3.bf16.msra.mxu0 %v1160_v16 }
  0x6a   :  { %1046 = vmatprep.subr.bf16.mxu0 %v1162_v18 }
  0x6b   :  { %1103 = vmatpush3.bf16.msra.mxu1 %v1161_v17 }
  0x6c   :  { %1104 = vmatprep.subr.bf16.mxu1 %v1164_v20 }
  0x6d   :  { %1047 = vmatpush3.bf16.msra.mxu0 %v1163_v19 }
  0x6e   :  { %1048 = vmatprep.subr.bf16.mxu0 %v1165_v21  ;;  %v1449_v21 = vsub.s32 0, %v1353_v13 }
  0x6f   :  { %1105 = vmatpush3.bf16.msra.mxu1 %v1164_v20  ;;  %v1446_v20 = vld [vmem:[%s1510_s3] sm:$0x1]  ;;  %s1277_s3 = smov [#allocation8]  }
  0x70   :  { %1106 = vmatprep.subr.bf16.mxu1 %v1167_v23 }
  0x71   :  { %1049 = vmatpush3.bf16.msra.mxu0 %v1166_v22 }
  0x72   :  { %1050 = vmatprep.subr.bf16.mxu0 %v1168_v24  ;;  %v1455_v24 = vld [vmem:[%s1511_s4] sm:$0x1]  ;;  %s913_s4 = sshll.u32 %s1277_s3, 4  ;;  %s914_s4 = int_to_ptr.vmem [resolvable:$true] %s913_s4 }
  0x73   :  { %1107 = vmatpush3.bf16.msra.mxu1 %v1167_v23  ;;  %s1241_s9 = scalar_lea.vmem %s914_s4, 512  ;;  %p1246_p11 = scmp.lt.s32.totalorder %s914_s4, %s914_s4 }
  0x74   :  { %1108 = vmatprep.subr.bf16.mxu1 %v1170_v26  ;;  %p1242_p10 = scmp.ne.s32.totalorder %s914_s4, %s1241_s9  ;;  %p1247_p12 = scmp.lt.s32.totalorder %s1241_s9, %s1241_s9 }
  0x75   :  { %1051 = vmatpush3.bf16.msra.mxu0 %v1169_v25 }
  0x76   :  { %p1248_p13 = por %p1247_p12, %p1246_p11 }
  0x77   :  { %1109 = vmatpush3.bf16.msra.mxu1 %v1170_v26 }
  0x78   :  { %p1249_p0 = pnand %p1248_p13, %p1242_p10 }
 0x12b   :  { %v1014_v27 = vpop.f32.mrb[0].mxu0 }
 0x12c   :  { %v1015_v28 = vpop.f32.mrb[1].mxu0 }
 0x12d   :  { %v1016_v29 = vadd.f32 %v1015_v28, %v1014_v27  ;;  %v1017_v30 = vpop.f32.mrb[2].mxu0  ;;  %v1092_v31 = vpop.f32.mrb[0].mxu1 }
 0x12e   :  { %v1018_v35 = vpop.f32.mrb[3].mxu0  ;;  %v501_v36 = vpop.f32.mrb[1].mxu1 }
 0x12f   :  { %v1019_v37 = vadd.f32 %v1018_v35, %v1017_v30  ;;  %v502_v38 = vadd.f32 %v1016_v29, %v501_v36  ;;  %v1093_v39 = vpop.f32.mrb[2].mxu1 }
 0x130   :  { %v504_v40 = vpop.f32.mrb[3].mxu1 }
 0x131   :  { %v505_v41 = vadd.f32 %v1019_v37, %v504_v40  ;;  %v525_v42 = vmul.f32 %v502_v38, %v502_v38 }
 0x133   :  { %v516_v45 = vadd.f32 %v505_v41, %v502_v38  ;;  %v526_v46 = vmul.f32 %v505_v41, %v505_v41  ;;  %v1020_v47 = vpop.f32.mrb[4].mxu0 }
 0x134   :  { %v1021_v48 = vpop.f32.mrb[5].mxu0 }
 0x135   :  { %v529_v49 = vadd.f32 %v526_v46, %v525_v42  ;;  %v1022_v50 = vadd.f32 %v1021_v48, %v1020_v47  ;;  %v1023_v52 = vpop.f32.mrb[6].mxu0 }
 0x136   :  { %v1024_v53 = vpop.f32.mrb[7].mxu0 }
 0x137   :  { %v510_v55 = vadd.f32 %v1092_v31, %v1022_v50  ;;  %v1025_v56 = vadd.f32 %v1024_v53, %v1023_v52 }
 0x139   :  { %v517_v57 = vadd.f32 %v516_v45, %v510_v55  ;;  %v527_v58 = vmul.f32 %v510_v55, %v510_v55  ;;  %v513_v59 = vadd.f32 %v1093_v39, %v1025_v56 }
 0x13b   :  { %v530_v60 = vadd.f32 %v529_v49, %v527_v58  ;;  %v518_v62 = vadd.f32 %v517_v57, %v513_v59  ;;  %v528_v63 = vmul.f32 %v513_v59, %v513_v59 }
 0x13d   :  { %v519_v0 = vrot.slane %v518_v62, 4  ;;  %v531_v1 = vadd.f32 %v530_v60, %v528_v63 }
 0x13f   :  { %v520_v2 = vadd.f32 %v519_v0, %v518_v62  ;;  %v532_v3 = vrot.slane %v531_v1, 4 }
 0x141   :  { %v521_v4 = vrot.slane %v520_v2, 2  ;;  %v533_v5 = vadd.f32 %v532_v3, %v531_v1 }
 0x143   :  { %v522_v6 = vadd.f32 %v521_v4, %v520_v2  ;;  %v534_v7 = vrot.slane %v533_v5, 2 }
 0x145   :  { %v523_v8 = vrot.slane %v522_v6, 1  ;;  %v535_v9 = vadd.f32 %v534_v7, %v533_v5 }
 0x147   :  { %v524_v10 = vadd.f32 %v523_v8, %v522_v6  ;;  %v536_v11 = vrot.slane %v535_v9, 1 }
 0x149   :  { %v537_v12 = vadd.f32 %v536_v11, %v535_v9  ;;  %v538_v14 = vmul.f32 0.03125, %v524_v10 }
 0x14b   :  { %v539_v15 = vmul.f32 0.03125, %v537_v12  ;;  %v540_v16 = vmul.f32 %v538_v14, %v538_v14 }
 0x14d   :  { %v541_v17 = vsub.f32 %v539_v15, %v540_v16 }
 0x14f   :  { %v542_v18 = vmax.f32 %v541_v17, 0.0 }
 0x151   :  { %v543_v19 = vadd.f32 1e-05, %v542_v18 }
 0x153   :  { %1171 = vrsqrt.f32 %v543_v19 }
 0x15d   :  { %v1172_v22 = vpop.eup %1171 }
 0x15e   :  { %v545_v23 = vmul.f32 %v1172_v22, %v1446_v20 }
 0x160   :  { %v546_v25 = vmul.f32 %v545_v23, %v538_v14  ;;  %v552_v26 = vrot.slane %v545_v23, %v1449_v21 }
 0x162   :  { %v547_v27 = vsub.f32 %v1455_v24, %v546_v25  ;;  %v557_v28 = vmul.f32 %v552_v26, %v513_v59  ;;  %v554_v29 = vmul.f32 %v552_v26, %v502_v38  ;;  %v555_v30 = vmul.f32 %v552_v26, %v505_v41 }
 0x163   :  { %v556_v31 = vmul.f32 %v552_v26, %v510_v55 }
 0x164   :  { %v562_v35 = vrot.slane %v547_v27, %v1449_v21 }
 0x166   :  { %v567_v36 = vadd.f32 %v562_v35, %v557_v28  ;;  %v564_v37 = vadd.f32 %v562_v35, %v554_v29  ;;  %v565_v39 = vadd.f32 %v562_v35, %v555_v30  ;;  %v566_v40 = vadd.f32 %v562_v35, %v556_v31 }
 0x168   :  { %v571_v42 = vmax.f32 %v567_v36, 0.0  ;;  %v568_v45 = vmax.f32 %v564_v37, 0.0  ;;  %v569_v46 = vmax.f32 %v565_v39, 0.0  ;;  %v570_v47 = vmax.f32 %v566_v40, 0.0 }
 0x16a   :  { %v575_v48 = vrot.slane %v571_v42, 7  ;;  %v587_v49 = vrot.slane %v571_v42, 1  ;;  %v572_v50 = vrot.slane %v568_v45, 7  ;;  %v573_v52 = vrot.slane %v569_v46, 7 }
 0x16b   :  { %v598_v53 = vpack.c.bf16 %v569_v46, %v568_v45  ;;  %v584_v56 = vrot.slane %v568_v45, 1  ;;  %v585_v57 = vrot.slane %v569_v46, 1  ;;  %v586_v38 = vrot.slane %v570_v47, 1 }
 0x16c   :  { %v578_v41 = vsel %vm230_vm0, %v572_v50, %v573_v52  ;;  %v579_v55 = vsel %vm230_vm0, %v575_v48, %v572_v50  ;;  %v599_v58 = vpack.c.bf16 %v571_v42, %v570_v47  ;;  %v574_v59 = vrot.slane %v570_v47, 7 }
 0x16d   :  { %778 = vmatprep.mubr.bf16.mxu0 %v598_v53  ;;  %v987_v60 = vpack.c.bf16 %v578_v41, %v579_v55  ;;  %v589_v62 = vsel %vm251_vm1, %v585_v57, %v586_v38  ;;  %v590_v63 = vsel %vm251_vm1, %v584_v56, %v585_v57  ;;  %v588_v0 = vsel %vm251_vm1, %v586_v38, %v587_v49 }
 0x16e   :  { %v993_v1 = vpack.c.bf16 %v589_v62, %v590_v63  ;;  %v591_v2 = vsel %vm251_vm1, %v587_v49, %v584_v56  ;;  %v576_v3 = vsel %vm230_vm0, %v574_v59, %v575_v48  ;;  %v577_v4 = vsel %vm230_vm0, %v573_v52, %v574_v59 }
 0x16f   :  { %988 = vmatmul.mubr.msk.bf16.vlgmr.msra.gmra.mrb[8].mxu0 %vm1389_vm6, %v987_v60  ;;  %v996_v5 = vpack.c.bf16 %v591_v2, %v588_v0  ;;  %v990_v6 = vpack.c.bf16 %v576_v3, %v577_v4 }
 0x170   :  { %1110 = vmatprep.mubr.msk.bf16.mxu1 %vm1404_vm7, %v993_v1  ;;  %786 = vmatprep.mubr.bf16.mxu0 %v599_v58 }
 0x171   :  { %1111 = vmatmul.mubr.msk.bf16.vlgmr.msra.gmra.mrb[4].mxu1 %vm1415_vm8, %v996_v5 }
 0x177   :  { %991 = vmatmul.mubr.msk.bf16.gmra.mrb[12].mxu0 %vm1429_vm10, %v990_v6 }
 0x242   :  { %v1052_v7 = vpop.f32.mrb[8].mxu0 }
 0x243   :  { %v1053_v8 = vpop.f32.mrb[9].mxu0 }
 0x244   :  { %v1054_v9 = vadd.f32 %v1053_v8, %v1052_v7  ;;  %v1112_v13 = vpop.f32.mrb[4].mxu1  ;;  %v1055_v10 = vpop.f32.mrb[10].mxu0 }
 0x245   :  { %v829_v11 = vpop.f32.mrb[5].mxu1  ;;  %v1056_v44 = vpop.f32.mrb[11].mxu0 }
 0x246   :  { %v830_v12 = vadd.f32 %v1054_v9, %v829_v11  ;;  %v1057_v14 = vadd.f32 %v1056_v44, %v1055_v10  ;;  %v1113_v15 = vpop.f32.mrb[6].mxu1 }
 0x247   :  { %v832_v16 = vpop.f32.mrb[7].mxu1 }
 0x248   :  { %v833_v51 = vadd.f32 %v1057_v14, %v832_v16  ;;  %v853_v17 = vmul.f32 %v830_v12, %v830_v12 }
 0x24a   :  { %v844_v18 = vadd.f32 %v833_v51, %v830_v12  ;;  %v854_v19 = vmul.f32 %v833_v51, %v833_v51  ;;  %v1058_v54 = vpop.f32.mrb[12].mxu0 }
 0x24b   :  { %v1059_v22 = vpop.f32.mrb[13].mxu0 }
 0x24c   :  { %v857_v23 = vadd.f32 %v854_v19, %v853_v17  ;;  %v1060_v61 = vadd.f32 %v1059_v22, %v1058_v54  ;;  %v1061_v25 = vpop.f32.mrb[14].mxu0 }
 0x24d   :  { %v1062_v26 = vpop.f32.mrb[15].mxu0 }
 0x24e   :  { %v838_v27 = vadd.f32 %v1112_v13, %v1060_v61  ;;  %v1063_v28 = vadd.f32 %v1062_v26, %v1061_v25 }
 0x250   :  { %v845_v29 = vadd.f32 %v844_v18, %v838_v27  ;;  %v855_v30 = vmul.f32 %v838_v27, %v838_v27  ;;  %v841_v31 = vadd.f32 %v1113_v15, %v1063_v28 }
 0x252   :  { %v858_v35 = vadd.f32 %v857_v23, %v855_v30  ;;  %v846_v36 = vadd.f32 %v845_v29, %v841_v31  ;;  %v856_v37 = vmul.f32 %v841_v31, %v841_v31 }
 0x254   :  { %v847_v39 = vrot.slane %v846_v36, 4  ;;  %v859_v40 = vadd.f32 %v858_v35, %v856_v37 }
 0x256   :  { %v848_v42 = vadd.f32 %v847_v39, %v846_v36  ;;  %v860_v45 = vrot.slane %v859_v40, 4 }
 0x258   :  { %v849_v46 = vrot.slane %v848_v42, 2  ;;  %v861_v47 = vadd.f32 %v860_v45, %v859_v40 }
 0x25a   :  { %v850_v48 = vadd.f32 %v849_v46, %v848_v42  ;;  %v862_v49 = vrot.slane %v861_v47, 2 }
 0x25c   :  { %v851_v50 = vrot.slane %v850_v48, 1  ;;  %v863_v52 = vadd.f32 %v862_v49, %v861_v47 }
 0x25e   :  { %v852_v53 = vadd.f32 %v851_v50, %v850_v48  ;;  %v864_v56 = vrot.slane %v863_v52, 1 }
 0x260   :  { %v865_v57 = vadd.f32 %v864_v56, %v863_v52  ;;  %v866_v38 = vmul.f32 0.03125, %v852_v53 }
 0x262   :  { %v867_v41 = vmul.f32 0.03125, %v865_v57  ;;  %v868_v55 = vmul.f32 %v866_v38, %v866_v38 }
 0x264   :  { %v869_v58 = vsub.f32 %v867_v41, %v868_v55 }
 0x266   :  { %v870_v59 = vmax.f32 %v869_v58, 0.0 }
 0x268   :  { %v871_v60 = vadd.f32 1e-05, %v870_v59 }
 0x26a   :  { %1173 = vrsqrt.f32 %v871_v60 }
 0x274   :  { %v1174_v62 = vpop.eup %1173 }
 0x275   :  { %v873_v63 = vmul.f32 %v1174_v62, %v1446_v20 }
 0x277   :  { %v874_v0 = vmul.f32 %v873_v63, %v866_v38  ;;  %v880_v1 = vrot.slane %v873_v63, %v1449_v21 }
 0x279   :  { %v875_v2 = vsub.f32 %v1455_v24, %v874_v0  ;;  %v885_v3 = vmul.f32 %v880_v1, %v841_v31  ;;  %v882_v4 = vmul.f32 %v880_v1, %v830_v12  ;;  %v883_v5 = vmul.f32 %v880_v1, %v833_v51 }
 0x27a   :  { %v884_v6 = vmul.f32 %v880_v1, %v838_v27 }
 0x27b   :  { %v890_v7 = vrot.slane %v875_v2, %v1449_v21 }
 0x27d   :  { %v895_v8 = vadd.f32 %v890_v7, %v885_v3  ;;  %v892_v9 = vadd.f32 %v890_v7, %v882_v4  ;;  %v893_v13 = vadd.f32 %v890_v7, %v883_v5  ;;  %v894_v10 = vadd.f32 %v890_v7, %v884_v6 }
 0x27f   :  { %v896_v11 = vadd.f32 %v892_v9, %v1365_v32  ;;  %v897_v20 = vadd.f32 %v893_v13, %v1367_v33  ;;  %v898_v44 = vadd.f32 %v894_v10, %v1384_v43  ;;  %v899_v24 = vadd.f32 %v895_v8, %v1369_v34 }
 0x281   :  { %v900_v14 = vmax.f32 %v896_v11, 0.0  ;;  %v901_v12 = vmax.f32 %v897_v20, 0.0  ;;  %v902_v15 = vmax.f32 %v898_v44, 0.0  ;;  %v903_v16 = vmax.f32 %v899_v24, 0.0 }
 0x283   :  { %904 = vst [vmem:[#allocation8] sm:$0xff] %v900_v14  ;;  %905 = vst [vmem:[#allocation8 + $0x8] sm:$0xff] %v901_v12 }
 0x284   :  { %906 = vst [vmem:[#allocation8 + $0x10] sm:$0xff] %v902_v15  ;;  %907 = vst [vmem:[#allocation8 + $0x18] sm:$0xff] %v903_v16 }
 0x285   :  { %1252 = shalt.err (!%p1249_p0)
}
 0x286   :  { %s1253_s12 = scalar_lea.hbm %s1512_s5, 512 }
 0x287   :  { %p1254_p1 = scmp.ne.s32.totalorder %s1512_s5, %s1253_s12  ;;  %p1257_p2 = scmp.lt.u32.totalorder %s1253_s12, %s1512_s5 }
 0x289   :  { %p1259_p3 = pnand %p1257_p2, %p1254_p1 }
 0x28b   :  { %1262 = shalt.err (!%p1259_p3)
}
 0x28c   :  { %919 = dma.vmem_to_hbm [thread:$0]  %s914_s4, 512, %s1512_s5, [#allocation4], %s1273_s1, %s1273_s1, %s1274_s17  }
 0x28d   :  { %1267 = dma.done.wait [#allocation4], 512  }
 0x28e   :  { %1268 = vsyncadd [#allocation4], 4294966784 }
 0x28f   :  { %923 = vsyncpa [#allocation3], 1 }
 0x290   :  { %924 = vsyncpa [#allocation6], 1 }
 0x291   :  { %925 = vsyncpa [#allocation4], 1 }

</bundles_post_ra>
